<compile_context>
chip_gen: v7x
topology: tpu7x:2x2x1
jax: 0.10.0
libtpu: 0.0.40
codegen_flags: <defaults>
</compile_context>

<pallas_src>
import jax
import jax.numpy as jnp
from jax.experimental import pallas as pl
from jax.experimental.pallas import tpu as pltpu

_LANE = 128          # vreg lane width
_SUBLANE = 8         # f32 sublane granule
_MXU_N = 256         # v6e/v7x MXU width (multiple of v5e's 128)
_MAX_TILE_M = 2048   # past this, per-step overhead is already well amortized


def _round_up(x, m):
    return ((x + m - 1) // m) * m


def _vmem_caps():
    """(physical_vmem_bytes, usable_budget_bytes) for the local TPU."""
    cap = 64 * 1024 * 1024                     # safe default (v7x: 64 MiB/TC)
    try:
        cap = int(pltpu.get_tpu_info().vmem_capacity_bytes)
    except Exception:
        pass
    budget = max(int(cap * 0.8), 16 * 1024 * 1024)   # ~20% headroom for Mosaic
    return cap, budget


def _linear_kernel(x_ref, w_ref, b_ref, o_ref):
    # y = x @ W + b.  W arrives pre-transposed as a (K, tile_n) lane-major
    # slab -> no in-kernel transpose, the matmul stays on the MXU with an f32
    # accumulator; the bias add happens in f32 before the final cast.
    y = jnp.dot(x_ref[...], w_ref[...], preferred_element_type=jnp.float32)
    o_ref[...] = (y + b_ref[...].astype(jnp.float32)).astype(o_ref.dtype)


def classify_init(weight, bias, *, compute_dtype=None):
    """One-time parameter prep for `classify_forward` (call once at init).

    weight: (n_classes, in_channels)   -- PyTorch nn.Linear layout
    bias:   (n_classes,)
    compute_dtype: e.g. jnp.bfloat16 to trade a little precision for ~2x MXU
                   rate / half the HBM bytes on v6e/v7x (default: weight dtype).
    """
    n_classes, in_channels = weight.shape
    dtype = jnp.dtype(compute_dtype) if compute_dtype is not None else jnp.dtype(weight.dtype)
    isize = dtype.itemsize
    cap, budget = _vmem_caps()

    # ---- class-dim (N) plan: keep the whole weight VMEM-resident if it fits
    # half the budget, otherwise stream (K, tile_n) slabs (tile_n a multiple of
    # 256 for the v6e/v7x MXU width, 128-granule floor).
    n_pad = _round_up(n_classes, _LANE)
    if in_channels * n_pad * isize <= budget // 2:
        tile_n, w_resident = n_pad, True
    else:
        gran = _MXU_N if n_pad >= _MXU_N else _LANE
        tile_n = (budget // 2) // (2 * in_channels * isize)   # 2 bufs when streamed
        tile_n = max(gran, (tile_n // gran) * gran)
        tile_n = min(tile_n, n_pad)
        w_resident = False
        # TODO(synk): if in_channels is so large that even one (K, 128) weight
        # slab misses the budget, a K-reduction grid axis would be needed;
        # not required for realistic Classify-head sizes.
    n_cols = _round_up(n_pad, tile_n)

    # ---- one-time layout plumbing (NOT in the per-forward path) ------------
    w_t = jnp.zeros((in_channels, n_cols), dtype=dtype)
    w_t = w_t.at[:, :n_classes].set(weight.T.astype(dtype))
    b_pad = jnp.zeros((1, n_cols), dtype=jnp.float32)          # bias stays f32
    b_pad = b_pad.at[:, :n_classes].set(bias.reshape(1, -1).astype(jnp.float32))

    return dict(w_t=w_t, b_pad=b_pad,
                n_classes=int(n_classes), in_channels=int(in_channels),
                tile_n=int(tile_n), w_resident=bool(w_resident),
                compute_dtype=dtype, vmem_cap=int(cap), vmem_budget=int(budget))


def classify_forward(x, params):
    """Pallas equivalent of Classify.forward: squeeze-logic(x @ W^T + b)."""
    w_t, b_pad = params["w_t"], params["b_pad"]
    n_classes = params["n_classes"]
    k = params["in_channels"]
    tile_n = params["tile_n"]
    cdt = params["compute_dtype"]
    cap, budget = params["vmem_cap"], params["vmem_budget"]

    assert x.shape[-1] == k, "last dim of x must equal in_channels"
    lead = x.shape[:-1]
    out_dtype = x.dtype
    x2 = x.reshape(-1, k).astype(cdt)
    m = x2.shape[0]
    n_cols = w_t.shape[1]
    grid_n = n_cols // tile_n

    in_isize = jnp.dtype(cdt).itemsize
    out_isize = jnp.dtype(out_dtype).itemsize

    # Constants are single-buffered only when their block never changes.
    w_bufs = 1 if (params["w_resident"] and grid_n == 1) else 2
    w_bytes = w_bufs * (k * tile_n * in_isize + tile_n * 4)

    # ---- batch (M) tiling from the remaining VMEM budget --------------------
    per_row = 2 * (k * in_isize + tile_n * out_isize)   # dbl-buffered x + out
    tile_m_max = max(budget - w_bytes, per_row * _SUBLANE) // per_row
    tile_m_max = max(_SUBLANE, min(_MAX_TILE_M, (tile_m_max // _SUBLANE) * _SUBLANE))

    if m <= tile_m_max:
        tile_m, m_pad = m, m              # one full-extent block, no padding
    else:
        m_pad = _round_up(m, _SUBLANE)
        q = m_pad // _SUBLANE             # largest multiple-of-8 divisor of the
        best, d = _SUBLANE, 1             # 8-aligned batch that fits the budget
        while d * d <= q:
            if q % d == 0:
                for c in (d, q // d):
                    if c * _SUBLANE <= tile_m_max:
                        best = max(best, c * _SUBLANE)
            d += 1
        tile_m = best
    grid_m = pl.cdiv(m_pad, tile_m)

    # v7x has 2 TensorCores: give the parallel grid >= 2 steps when it's free.
    if grid_m * grid_n == 1 and m >= 16 and m % 16 == 0:
        tile_m, grid_m = m // 2, 2

    if m_pad != m:   # only when batch isn't a multiple of 8 AND exceeds a tile
        x2 = jnp.pad(x2, ((0, m_pad - m), (0, 0)))

    footprint = (2 * tile_m * k * in_isize        # x: double-buffered
                 + w_bytes                        # W + bias: actual buffer count
                 + 2 * tile_m * tile_n * out_isize)  # out: double-buffered
    vmem_limit = int(min(cap, max(footprint + 4 * 1024 * 1024, 32 * 1024 * 1024)))

    cost = pl.CostEstimate(
        flops=2 * m_pad * k * n_cols,
        transcendentals=0,
        bytes_accessed=(m_pad * k * in_isize + k * n_cols * in_isize
                        + n_cols * 4 + m_pad * n_cols * out_isize),
    )

    # Grid order: class-dim slabs OUTER, batch tiles INNER -> each weight slab
    # is DMA'd exactly once; only the (smaller) x tiles get re-streamed.
    def build(single_buffer_consts):
        const_kw = {}
        if single_buffer_consts and w_bufs == 1:
            const_kw = dict(pipeline_mode=pl.Buffered(1))
        # NOTE: for tiny-N heads (x-stream bound), sweeping pl.Buffered(3) on
        # the x spec is a cheap follow-up once tile sizing is VMEM-aware.
        return pl.pallas_call(
            _linear_kernel,
            out_shape=jax.ShapeDtypeStruct((m_pad, n_cols), out_dtype),
            grid=(grid_n, grid_m),
            in_specs=[
                pl.BlockSpec((tile_m, k), lambda j, i: (i, 0)),               # x
                pl.BlockSpec((k, tile_n), lambda j, i: (0, j), **const_kw),   # W
                pl.BlockSpec((1, tile_n), lambda j, i: (0, j), **const_kw),   # b
            ],
            out_specs=pl.BlockSpec((tile_m, tile_n), lambda j, i: (i, j)),
            compiler_params=pltpu.CompilerParams(
                dimension_semantics=("parallel", "parallel"),
                vmem_limit_bytes=vmem_limit,
            ),
            cost_estimate=cost,
        )

    try:
        y = build(True)(x2, w_t, b_pad)
    except Exception:
        # Fallback for jax versions without BlockSpec(pipeline_mode=...).
        y = build(False)(x2, w_t, b_pad)

    # Strip padding, restore leading dims, reproduce torch's squeeze semantics.
    y = y[:m, :n_classes].reshape(*lead, n_classes)
    if y.shape[0] == 1:
        y = jnp.expand_dims(jnp.squeeze(y), 0)   # torch: x.squeeze().unsqueeze(0)
    else:
        y = jnp.squeeze(y)                       # torch: x.squeeze()
    return y


if __name__ == "__main__":
    batch = 2
    in_channels = 32
    n_classes = 8

    key = jax.random.PRNGKey(0)
    kx, kw, kb = jax.random.split(key, 3)

    x = jax.random.normal(kx, (batch, in_channels), dtype=jnp.float32)
    # nn.Linear convention: W (out, in), b (out,)
    weight = jax.random.normal(kw, (n_classes, in_channels), dtype=jnp.float32) * 0.1
    bias = jax.random.normal(kb, (n_classes,), dtype=jnp.float32) * 0.1

    params = classify_init(weight, bias)      # one-time prep (hoisted)
    out = classify_forward(x, params)
    out = jax.block_until_ready(out)

    # Reference: plain JAX linear + identical squeeze glue.
    ref = x @ weight.T + bias
    if ref.shape[0] == 1:
        ref = jnp.expand_dims(jnp.squeeze(ref), 0)
    else:
        ref = jnp.squeeze(ref)

    assert out.shape == ref.shape
    assert jnp.allclose(out, ref, atol=1e-5, rtol=1e-5)

    print("KERNEL_OK")
</pallas_src>

<mosaic_0001>
module attributes {stable_mosaic.version = 11 : i64} {
  func.func @_linear_kernel(%arg0: i32, %arg1: i32, %arg2: memref<2x32xf32, #tpu.memory_space<vmem>>, %arg3: memref<32x128xf32, #tpu.memory_space<vmem>>, %arg4: memref<1x128xf32, #tpu.memory_space<vmem>>, %arg5: memref<2x128xf32, #tpu.memory_space<vmem>>) attributes {dimension_semantics = [#tpu.dimension_semantics<parallel>, #tpu.dimension_semantics<parallel>], iteration_bounds = array<i64: 1, 1>, scalar_prefetch = 0 : i64, scratch_operands = 0 : i64, tpu.core_type = #tpu.core_type<tc>, window_params = [{transform_indices = @transform_0, window_bounds = array<i64: 2, 32>}, {pipeline_mode = #tpu.pipeline_mode<synchronous>, transform_indices = @transform_1, window_bounds = array<i64: 32, 128>}, {pipeline_mode = #tpu.pipeline_mode<synchronous>, transform_indices = @transform_2, window_bounds = array<i64: 1, 128>}, {transform_indices = @transform_3, window_bounds = array<i64: 2, 128>}]} {
    %c0 = arith.constant 0 : index
    %c0_0 = arith.constant 0 : index
    %0 = vector.load %arg2[%c0, %c0_0] : memref<2x32xf32, #tpu.memory_space<vmem>>, vector<2x32xf32>
    %c0_1 = arith.constant 0 : index
    %c0_2 = arith.constant 0 : index
    %1 = vector.load %arg3[%c0_1, %c0_2] : memref<32x128xf32, #tpu.memory_space<vmem>>, vector<32x128xf32>
    %cst = arith.constant dense<0.000000e+00> : vector<2x128xf32>
    %2 = tpu.matmul %0, %1, %cst {dimension_numbers = #tpu.dot_dimension_numbers<[1], [0], [0], [1], [0, 0, 1, 1], [], []>} : vector<2x32xf32>, vector<32x128xf32>, vector<2x128xf32> -> vector<2x128xf32>
    %c0_3 = arith.constant 0 : index
    %c0_4 = arith.constant 0 : index
    %3 = vector.load %arg4[%c0_3, %c0_4] : memref<1x128xf32, #tpu.memory_space<vmem>>, vector<1x128xf32>
    %4 = vector.broadcast %3 : vector<1x128xf32> to vector<2x128xf32>
    %5 = arith.addf %2, %4 : vector<2x128xf32>
    %c0_5 = arith.constant 0 : index
    %c0_6 = arith.constant 0 : index
    %6 = vector.load %arg5[%c0_5, %c0_6] : memref<2x128xf32, #tpu.memory_space<vmem>>, vector<2x128xf32>
    tpu.vector_store %arg5[%c0_5, %c0_6], %5 {strides = array<i32>} : memref<2x128xf32, #tpu.memory_space<vmem>>, vector<2x128xf32>,
    return
  }
  func.func @transform_0(%arg0: i32, %arg1: i32) -> (i32, i32) {
    %c0_i32 = arith.constant 0 : i32
    %c0_i32_0 = arith.constant 0 : i32
    return %arg1, %c0_i32 : i32, i32
  }
  func.func @transform_1(%arg0: i32, %arg1: i32) -> (i32, i32) {
    %c0_i32 = arith.constant 0 : i32
    %c0_i32_0 = arith.constant 0 : i32
    return %c0_i32, %arg0 : i32, i32
  }
  func.func @transform_2(%arg0: i32, %arg1: i32) -> (i32, i32) {
    %c0_i32 = arith.constant 0 : i32
    %c0_i32_0 = arith.constant 0 : i32
    return %c0_i32, %arg0 : i32, i32
  }
  func.func @transform_3(%arg0: i32, %arg1: i32) -> (i32, i32) {
    %c0_i32 = arith.constant 0 : i32
    return %arg1, %arg0 : i32, i32
  }
}

module attributes {stable_mosaic.version = 11 : i64} {
  func.func @_linear_kernel(%arg0: i32, %arg1: i32, %arg2: memref<2x32xf32, #tpu.memory_space<vmem>>, %arg3: memref<32x128xf32, #tpu.memory_space<vmem>>, %arg4: memref<1x128xf32, #tpu.memory_space<vmem>>, %arg5: memref<2x128xf32, #tpu.memory_space<vmem>>) attributes {dimension_semantics = [#tpu.dimension_semantics<parallel>, #tpu.dimension_semantics<parallel>], iteration_bounds = array<i64: 1, 1>, scalar_prefetch = 0 : i64, scratch_operands = 0 : i64, tpu.core_type = #tpu.core_type<tc>, window_params = [{transform_indices = @transform_0, window_bounds = array<i64: 2, 32>}, {transform_indices = @transform_1, window_bounds = array<i64: 32, 128>}, {transform_indices = @transform_2, window_bounds = array<i64: 1, 128>}, {transform_indices = @transform_3, window_bounds = array<i64: 2, 128>}]} {
    %c0 = arith.constant 0 : index
    %c0_0 = arith.constant 0 : index
    %0 = vector.load %arg2[%c0, %c0_0] : memref<2x32xf32, #tpu.memory_space<vmem>>, vector<2x32xf32>
    %c0_1 = arith.constant 0 : index
    %c0_2 = arith.constant 0 : index
    %1 = vector.load %arg3[%c0_1, %c0_2] : memref<32x128xf32, #tpu.memory_space<vmem>>, vector<32x128xf32>
    %cst = arith.constant dense<0.000000e+00> : vector<2x128xf32>
    %2 = tpu.matmul %0, %1, %cst {dimension_numbers = #tpu.dot_dimension_numbers<[1], [0], [0], [1], [0, 0, 1, 1], [], []>} : vector<2x32xf32>, vector<32x128xf32>, vector<2x128xf32> -> vector<2x128xf32>
    %c0_3 = arith.constant 0 : index
    %c0_4 = arith.constant 0 : index
    %3 = vector.load %arg4[%c0_3, %c0_4] : memref<1x128xf32, #tpu.memory_space<vmem>>, vector<1x128xf32>
    %4 = vector.broadcast %3 : vector<1x128xf32> to vector<2x128xf32>
    %5 = arith.addf %2, %4 : vector<2x128xf32>
    %c0_5 = arith.constant 0 : index
    %c0_6 = arith.constant 0 : index
    %6 = vector.load %arg5[%c0_5, %c0_6] : memref<2x128xf32, #tpu.memory_space<vmem>>, vector<2x128xf32>
    tpu.vector_store %arg5[%c0_5, %c0_6], %5 {strides = array<i32>} : memref<2x128xf32, #tpu.memory_space<vmem>>, vector<2x128xf32>,
    return
  }
  func.func @transform_0(%arg0: i32, %arg1: i32) -> (i32, i32) {
    %c0_i32 = arith.constant 0 : i32
    %c0_i32_0 = arith.constant 0 : i32
    return %arg1, %c0_i32 : i32, i32
  }
  func.func @transform_1(%arg0: i32, %arg1: i32) -> (i32, i32) {
    %c0_i32 = arith.constant 0 : i32
    %c0_i32_0 = arith.constant 0 : i32
    return %c0_i32, %arg0 : i32, i32
  }
  func.func @transform_2(%arg0: i32, %arg1: i32) -> (i32, i32) {
    %c0_i32 = arith.constant 0 : i32
    %c0_i32_0 = arith.constant 0 : i32
    return %c0_i32, %arg0 : i32, i32
  }
  func.func @transform_3(%arg0: i32, %arg1: i32) -> (i32, i32) {
    %c0_i32 = arith.constant 0 : i32
    return %arg1, %arg0 : i32, i32
  }
}

</mosaic_0001>

<bundles_post_ra>
// kernel: tpu_custom_call.1
= control target key start
LH: loop header
LB: loop body
LE: loop exit
PB: predicated region body
PF: predicated region fallthrough
CT: control target
= control target key end

     0   :  { %8 = vsyncpa [#allocation3], 0  ;;  %s322_s0 = inlined_call_operand.hbm [shape: f32[2,32], index: 0, kind: input, shape index: {}]   ;;  %s323_s1 = inlined_call_operand.hbm [shape: f32[32,128], index: 1, kind: input, shape index: {}]   ;;  %s324_s2 = inlined_call_operand.vmem [shape: f32[1,128], index: 2, kind: input, shape index: {}]   ;;  %s325_s3 = inlined_call_operand.hbm [shape: f32[2,128], index: 3, kind: output, shape index: {}]  }
   0x1   :  { %9 = vsyncpa [#allocation6], 0 }
   0x2   :  { %10 = vsyncpa [#allocation4], 0  ;;  %s248_s12 = smov [#allocation2]   ;;  %s249_s14 = smov [#allocation5]  }
   0x3   :  { %s17_s13 = sshll.u32 %s248_s12, 4  ;;  %s26_s15 = sshll.u32 %s249_s14, 4  ;;  %s18_s13 = int_to_ptr.vmem [resolvable:$true] %s17_s13  ;;  %s276_s15 = int_to_ptr.vmem [resolvable:$true] %s26_s15 }
   0x4   :  { %s176_s18 = scalar_lea.hbm %s322_s0, 32 }
   0x5   :  { %p177_p0 = scmp.ne.s32.totalorder %s322_s0, %s176_s18  ;;  %p180_p1 = scmp.lt.u32.totalorder %s176_s18, %s322_s0 }
   0x7   :  { %p182_p2 = pnand %p180_p1, %p177_p0 }
   0x9   :  { %185 = shalt.err (!%p182_p2)
}
   0xa   :  { %s186_s23 = scalar_lea.vmem %s18_s13, 32  ;;  %p191_p4 = scmp.lt.s32.totalorder %s18_s13, %s18_s13 }
   0xb   :  { %p187_p3 = scmp.ne.s32.totalorder %s18_s13, %s186_s23  ;;  %p192_p5 = scmp.lt.s32.totalorder %s186_s23, %s186_s23 }
   0xd   :  { %p193_p6 = por %p192_p5, %p191_p4 }
   0xf   :  { %p194_p7 = pnand %p193_p6, %p187_p3 }
  0x11   :  { %197 = shalt.err (!%p194_p7)
}
  0x12   :  { %20 = dma.hbm_to_vmem [thread:$0]  %s322_s0, 32, %s18_s13, [#allocation3]  }
  0x13   :  { %s198_s28 = scalar_lea.hbm %s323_s1, 512 }
  0x14   :  { %p199_p8 = scmp.ne.s32.totalorder %s323_s1, %s198_s28  ;;  %p202_p9 = scmp.lt.u32.totalorder %s198_s28, %s323_s1 }
  0x16   :  { %p204_p10 = pnand %p202_p9, %p199_p8 }
  0x18   :  { %207 = shalt.err (!%p204_p10)
}
  0x19   :  { %s208_s6 = scalar_lea.vmem %s276_s15, 512  ;;  %p213_p12 = scmp.lt.s32.totalorder %s276_s15, %s276_s15 }
  0x1a   :  { %p209_p11 = scmp.ne.s32.totalorder %s276_s15, %s208_s6  ;;  %p214_p13 = scmp.lt.s32.totalorder %s208_s6, %s208_s6 }
  0x1c   :  { %p215_p0 = por %p214_p13, %p213_p12 }
  0x1e   :  { %p216_p1 = pnand %p215_p0, %p209_p11 }
  0x20   :  { %219 = shalt.err (!%p216_p1)
}
  0x21   :  { %s250_s0 = smov 128   ;;  %s251_s7 = smov 8  }
  0x22   :  { %32 = dma.hbm_to_vmem [thread:$0]  %s323_s1, 512, %s276_s15, [#allocation6], %s250_s0, %s250_s0, %s251_s7  }
  0x23   :  { %242 = dma.done.wait [#allocation3], 32  }
  0x24   :  { %243 = vsyncadd [#allocation3], 4294967264 }
  0x25   :  { %244 = dma.done.wait [#allocation6], 512  }
  0x26   :  { %245 = vsyncadd [#allocation6], 4294966784  ;;  %v252_v0 = vmov 0.0|0.0   ;;  %vm253_vm0 = vmmov 0   ;;  %v254_v1 = vmov 0.0   ;;  %v42_v2 = vld [vmem:[#allocation5] sm:$0xff] }
  0x27   :  { %162 = vmatprep.subr.bf16.mxu0 %v252_v0  ;;  %159 = vmatprep.mubr.msk.f32.mxu0 %vm253_vm0, %v254_v1  ;;  %v43_v3 = vld [vmem:[#allocation5 + $0x8] sm:$0xff]  ;;  %v44_v4 = vld [vmem:[#allocation5 + $0x10] sm:$0xff]  ;;  %v45_v6 = vld [vmem:[#allocation5 + $0x18] sm:$0xff]  ;;  %vm53_vm1 = vcmask 261120   ;;  %s255_s11 = smov [#allocation7]  }
  0x28   :  { %v163_v5 = vpack.c.bf16 %v43_v3, %v42_v2  ;;  %v166_v7 = vpack.c.bf16 %v45_v6, %v44_v4  ;;  %v41_v8 = vld [vmem:[#allocation2] sm:$0x3]  ;;  %s134_s12 = sshll.u32 %s255_s11, 4  ;;  %s135_s12 = int_to_ptr.vmem [resolvable:$true] %s134_s12 }
  0x29   :  { %v144_v9 = vld [vmem:[%s324_s2] ss:$0 sm:$0xff]  ;;  %s220_s13 = scalar_lea.vmem %s135_s12, 32  ;;  %p225_p3 = scmp.lt.s32.totalorder %s135_s12, %s135_s12 }
  0x2a   :  { %164 = vmatpush3.bf16.msra.mxu0 %v163_v5  ;;  %p221_p2 = scmp.ne.s32.totalorder %s135_s12, %s220_s13  ;;  %p226_p4 = scmp.lt.s32.totalorder %s220_s13, %s220_s13 }
  0x2b   :  { %165 = vmatprep.subr.bf16.mxu0 %v252_v0 }
  0x2c   :  { %p227_p5 = por %p226_p4, %p225_p3 }
  0x2e   :  { %167 = vmatpush3.bf16.msra.mxu0 %v166_v7  ;;  %p228_p6 = pnand %p227_p5, %p221_p2 }
  0x31   :  { %160 = vmatmul.mubr.msk.f32.vlgmr.msra.gmra.mrb[0].mxu0 %vm53_vm1, %v41_v8 }
 0x104   :  { %v123_v10 = vpop.f32.mrb[0].mxu0 }
 0x105   :  { %v124_v11 = vadd.f32 %v144_v9, %v123_v10  ;;  %v161_v12 = vpop.f32.mrb[1].mxu0 }
 0x107   :  { %127 = vst [vmem:[#allocation7] sm:$0x3] %v124_v11 }
 0x108   :  { %231 = shalt.err (!%p228_p6)
}
 0x109   :  { %s232_s16 = scalar_lea.hbm %s325_s3, 32 }
 0x10a   :  { %p233_p7 = scmp.ne.s32.totalorder %s325_s3, %s232_s16  ;;  %p236_p8 = scmp.lt.u32.totalorder %s232_s16, %s325_s3 }
 0x10c   :  { %p238_p9 = pnand %p236_p8, %p233_p7 }
 0x10e   :  { %241 = shalt.err (!%p238_p9)
}
 0x10f   :  { %137 = dma.vmem_to_hbm [thread:$0]  %s135_s12, 32, %s325_s3, [#allocation4]  }
 0x110   :  { %246 = dma.done.wait [#allocation4], 32  }
 0x111   :  { %247 = vsyncadd [#allocation4], 4294967264 }
 0x112   :  { %141 = vsyncpa [#allocation3], 1 }
 0x113   :  { %142 = vsyncpa [#allocation6], 1 }
 0x114   :  { %143 = vsyncpa [#allocation4], 1 }

// kernel: tpu_custom_call.1
= control target key start
LH: loop header
LB: loop body
LE: loop exit
PB: predicated region body
PF: predicated region fallthrough
CT: control target
= control target key end

     0   :  { %8 = vsyncpa [#allocation3], 0  ;;  %s322_s0 = inlined_call_operand.hbm [shape: f32[2,32], index: 0, kind: input, shape index: {}]   ;;  %s323_s1 = inlined_call_operand.hbm [shape: f32[32,128], index: 1, kind: input, shape index: {}]   ;;  %s324_s2 = inlined_call_operand.vmem [shape: f32[1,128], index: 2, kind: input, shape index: {}]   ;;  %s325_s3 = inlined_call_operand.hbm [shape: f32[2,128], index: 3, kind: output, shape index: {}]  }
   0x1   :  { %9 = vsyncpa [#allocation6], 0 }
   0x2   :  { %10 = vsyncpa [#allocation4], 0  ;;  %s248_s12 = smov [#allocation2]   ;;  %s249_s14 = smov [#allocation5]  }
   0x3   :  { %s17_s13 = sshll.u32 %s248_s12, 4  ;;  %s26_s15 = sshll.u32 %s249_s14, 4  ;;  %s18_s13 = int_to_ptr.vmem [resolvable:$true] %s17_s13  ;;  %s276_s15 = int_to_ptr.vmem [resolvable:$true] %s26_s15 }
   0x4   :  { %s176_s18 = scalar_lea.hbm %s322_s0, 32 }
   0x5   :  { %p177_p0 = scmp.ne.s32.totalorder %s322_s0, %s176_s18  ;;  %p180_p1 = scmp.lt.u32.totalorder %s176_s18, %s322_s0 }
   0x7   :  { %p182_p2 = pnand %p180_p1, %p177_p0 }
   0x9   :  { %185 = shalt.err (!%p182_p2)
}
   0xa   :  { %s186_s23 = scalar_lea.vmem %s18_s13, 32  ;;  %p191_p4 = scmp.lt.s32.totalorder %s18_s13, %s18_s13 }
   0xb   :  { %p187_p3 = scmp.ne.s32.totalorder %s18_s13, %s186_s23  ;;  %p192_p5 = scmp.lt.s32.totalorder %s186_s23, %s186_s23 }
   0xd   :  { %p193_p6 = por %p192_p5, %p191_p4 }
   0xf   :  { %p194_p7 = pnand %p193_p6, %p187_p3 }
  0x11   :  { %197 = shalt.err (!%p194_p7)
}
  0x12   :  { %20 = dma.hbm_to_vmem [thread:$0]  %s322_s0, 32, %s18_s13, [#allocation3]  }
  0x13   :  { %s198_s28 = scalar_lea.hbm %s323_s1, 512 }
  0x14   :  { %p199_p8 = scmp.ne.s32.totalorder %s323_s1, %s198_s28  ;;  %p202_p9 = scmp.lt.u32.totalorder %s198_s28, %s323_s1 }
  0x16   :  { %p204_p10 = pnand %p202_p9, %p199_p8 }
  0x18   :  { %207 = shalt.err (!%p204_p10)
}
  0x19   :  { %s208_s6 = scalar_lea.vmem %s276_s15, 512  ;;  %p213_p12 = scmp.lt.s32.totalorder %s276_s15, %s276_s15 }
  0x1a   :  { %p209_p11 = scmp.ne.s32.totalorder %s276_s15, %s208_s6  ;;  %p214_p13 = scmp.lt.s32.totalorder %s208_s6, %s208_s6 }
  0x1c   :  { %p215_p0 = por %p214_p13, %p213_p12 }
  0x1e   :  { %p216_p1 = pnand %p215_p0, %p209_p11 }
  0x20   :  { %219 = shalt.err (!%p216_p1)
}
  0x21   :  { %s250_s0 = smov 128   ;;  %s251_s7 = smov 8  }
  0x22   :  { %32 = dma.hbm_to_vmem [thread:$0]  %s323_s1, 512, %s276_s15, [#allocation6], %s250_s0, %s250_s0, %s251_s7  }
  0x23   :  { %242 = dma.done.wait [#allocation3], 32  }
  0x24   :  { %243 = vsyncadd [#allocation3], 4294967264 }
  0x25   :  { %244 = dma.done.wait [#allocation6], 512  }
  0x26   :  { %245 = vsyncadd [#allocation6], 4294966784  ;;  %v252_v0 = vmov 0.0|0.0   ;;  %vm253_vm0 = vmmov 0   ;;  %v254_v1 = vmov 0.0   ;;  %v42_v2 = vld [vmem:[#allocation5] sm:$0xff] }
  0x27   :  { %162 = vmatprep.subr.bf16.mxu0 %v252_v0  ;;  %159 = vmatprep.mubr.msk.f32.mxu0 %vm253_vm0, %v254_v1  ;;  %v43_v3 = vld [vmem:[#allocation5 + $0x8] sm:$0xff]  ;;  %v44_v4 = vld [vmem:[#allocation5 + $0x10] sm:$0xff]  ;;  %v45_v6 = vld [vmem:[#allocation5 + $0x18] sm:$0xff]  ;;  %vm53_vm1 = vcmask 261120   ;;  %s255_s11 = smov [#allocation7]  }
  0x28   :  { %v163_v5 = vpack.c.bf16 %v43_v3, %v42_v2  ;;  %v166_v7 = vpack.c.bf16 %v45_v6, %v44_v4  ;;  %v41_v8 = vld [vmem:[#allocation2] sm:$0x3]  ;;  %s134_s12 = sshll.u32 %s255_s11, 4  ;;  %s135_s12 = int_to_ptr.vmem [resolvable:$true] %s134_s12 }
  0x29   :  { %v144_v9 = vld [vmem:[%s324_s2] ss:$0 sm:$0xff]  ;;  %s220_s13 = scalar_lea.vmem %s135_s12, 32  ;;  %p225_p3 = scmp.lt.s32.totalorder %s135_s12, %s135_s12 }
  0x2a   :  { %164 = vmatpush3.bf16.msra.mxu0 %v163_v5  ;;  %p221_p2 = scmp.ne.s32.totalorder %s135_s12, %s220_s13  ;;  %p226_p4 = scmp.lt.s32.totalorder %s220_s13, %s220_s13 }
  0x2b   :  { %165 = vmatprep.subr.bf16.mxu0 %v252_v0 }
  0x2c   :  { %p227_p5 = por %p226_p4, %p225_p3 }
  0x2e   :  { %167 = vmatpush3.bf16.msra.mxu0 %v166_v7  ;;  %p228_p6 = pnand %p227_p5, %p221_p2 }
  0x31   :  { %160 = vmatmul.mubr.msk.f32.vlgmr.msra.gmra.mrb[0].mxu0 %vm53_vm1, %v41_v8 }
 0x104   :  { %v123_v10 = vpop.f32.mrb[0].mxu0 }
 0x105   :  { %v124_v11 = vadd.f32 %v144_v9, %v123_v10  ;;  %v161_v12 = vpop.f32.mrb[1].mxu0 }
 0x107   :  { %127 = vst [vmem:[#allocation7] sm:$0x3] %v124_v11 }
 0x108   :  { %231 = shalt.err (!%p228_p6)
}
 0x109   :  { %s232_s16 = scalar_lea.hbm %s325_s3, 32 }
 0x10a   :  { %p233_p7 = scmp.ne.s32.totalorder %s325_s3, %s232_s16  ;;  %p236_p8 = scmp.lt.u32.totalorder %s232_s16, %s325_s3 }
 0x10c   :  { %p238_p9 = pnand %p236_p8, %p233_p7 }
 0x10e   :  { %241 = shalt.err (!%p238_p9)
}
 0x10f   :  { %137 = dma.vmem_to_hbm [thread:$0]  %s135_s12, 32, %s325_s3, [#allocation4]  }
 0x110   :  { %246 = dma.done.wait [#allocation4], 32  }
 0x111   :  { %247 = vsyncadd [#allocation4], 4294967264 }
 0x112   :  { %141 = vsyncpa [#allocation3], 1 }
 0x113   :  { %142 = vsyncpa [#allocation6], 1 }
 0x114   :  { %143 = vsyncpa [#allocation4], 1 }

</bundles_post_ra>
